<compile_context>
chip_gen: v6e
topology: v6e:2x2x1
jax: 0.10.0
libtpu: 0.0.40
codegen_flags: <defaults>
</compile_context>

<pallas_src>
import math

import jax
import jax.numpy as jnp
from jax.experimental import pallas as pl
from jax.experimental.pallas import tpu as pltpu

_HALF_PI = math.pi / 2.0
_QUARTER_PI = math.pi / 4.0
_TAN_3PI_8 = 2.414213562373095     # tan(3*pi/8)
_TAN_PI_8 = 0.4142135623730951     # tan(pi/8)
_SCALE = 1.8 / math.pi             # 0.9 * (1/90) * (180/pi)


def _on_right_kernel(x1_ref, y1_ref, x2_ref, y2_ref, o_ref):
    """Blocks are dense (rt, 128) f32 tiles; batch is packed on sublanes+lanes."""
    dx = x1_ref[...].astype(jnp.float32) - x2_ref[...].astype(jnp.float32)
    dy = y1_ref[...].astype(jnp.float32) - y2_ref[...].astype(jnp.float32)

    ax = jnp.abs(dx)
    ay = jnp.abs(dy)

    # Branchless Cephes-style range reduction for atan(ay/ax) on [0, pi/2],
    # with all three branches collapsed into a single divide.
    # TODO(synk): switch to jnp.arctan2 once lax.atan2 lowering is guaranteed on Mosaic.
    big = ay > ax * _TAN_3PI_8
    mid = ay > ax * _TAN_PI_8
    num = jnp.where(big, -ax, jnp.where(mid, ay - ax, ay))
    den = jnp.where(big, ay, jnp.where(mid, ax + ay,
                                       jnp.where(ax > 0.0, ax, 1.0)))
    xr = num / den                                        # |xr| <= tan(pi/8)
    y0 = jnp.where(big, _HALF_PI, jnp.where(mid, _QUARTER_PI, 0.0))

    z = xr * xr
    p = ((((8.05374449538e-2 * z - 1.38776856032e-1) * z
           + 1.99777106478e-1) * z - 3.33329491539e-1) * z * xr) + xr
    r = y0 + p                                            # atan(ay/ax) in [0, pi/2]
    # For dx==0: dy==0 -> r=0 (out 0.9); dy!=0 -> r=pi/2 (out 0). Matches torch.
    o_ref[...] = jnp.where(dx >= 0.0, 0.9 - _SCALE * r, 0.0)


def _round_up(n, m):
    return ((n + m - 1) // m) * m


def on_right_valuation(z_1, z_2, *, target_rows=1024, use_kernel=None):
    """z_1, z_2: (B, D) with D >= 2 (last two columns are X, Y). Returns (B,) f32."""
    B, D = z_1.shape
    assert z_2.shape == (B, D) and D >= 2

    if use_kernel is None:
        # For small batches the fused XLA path wins end-to-end (wrapper layout
        # passes + kernel launch overhead dominate the ~50 VPU ops/elem).
        use_kernel = B >= 4096
    if not use_kernel:
        return _reference(z_1, z_2)

    # Per-column extraction only (no (B,2)->(2,B) transpose pass).
    x1 = z_1[:, D - 2]
    y1 = z_1[:, D - 1]
    x2 = z_2[:, D - 2]
    y2 = z_2[:, D - 1]

    # Dense (rows, 128) layout. Pad to vreg granularity (8 sublanes x 128 lanes),
    # then pick rt (multiple of 8, <= target_rows) so padding waste stays ~1 vreg
    # row per block instead of a full tile.
    rows = _round_up(pl.cdiv(B, 128), 8)
    n_blocks = pl.cdiv(rows, target_rows)
    rt = _round_up(pl.cdiv(rows, n_blocks), 8)
    rows_pad = rt * n_blocks
    b_pad = rows_pad * 128

    def prep(v):
        return jnp.pad(v, (0, b_pad - B)).reshape(rows_pad, 128)

    x1, y1, x2, y2 = prep(x1), prep(y1), prep(x2), prep(y2)

    spec = pl.BlockSpec((rt, 128), lambda i: (i, 0))
    out = pl.pallas_call(
        _on_right_kernel,
        out_shape=jax.ShapeDtypeStruct((rows_pad, 128), jnp.float32),
        grid=(n_blocks,),
        in_specs=[spec, spec, spec, spec],
        out_specs=spec,
        compiler_params=pltpu.CompilerParams(
            dimension_semantics=("parallel",),
            vmem_limit_bytes=32 * 1024 * 1024,
        ),
    )(x1, y1, x2, y2)
    # Padded tail (zero inputs) yields 0.9; it is sliced away here and the
    # padded buffer is never consumed directly.
    return out.reshape(b_pad)[:B]


def _reference(z_1, z_2):
    c1 = z_1[:, -2:].astype(jnp.float32)
    c2 = z_2[:, -2:].astype(jnp.float32)
    dx = c1[:, 0] - c2[:, 0]
    dy = c1[:, 1] - c2[:, 1]
    degree = jnp.arctan2(dy, dx) / jnp.pi * 180.0
    probs = 1.0 - jnp.abs(degree) / 90.0
    return jnp.where((degree <= 90.0) & (degree >= -90.0), probs * 0.9, 0.0)


if __name__ == "__main__":
    key = jax.random.PRNGKey(0)
    k1, k2 = jax.random.split(key)

    B, D = 2, 9  # [agent, key, door, blue, green, red, got_key, X, Y]
    z1 = jax.random.uniform(k1, (B, D), dtype=jnp.float32)
    z2 = jax.random.uniform(k2, (B, D), dtype=jnp.float32)

    out = on_right_valuation(z1, z2, use_kernel=True)
    jax.block_until_ready(out)
    ref = _reference(z1, z2)
    assert out.shape == (B,)
    assert jnp.allclose(out, ref, atol=1e-4), (out, ref)

    # Larger check: exercises padding and all four quadrants (incl. dx<0 mask).
    B2 = 300
    k3, k4 = jax.random.split(k2)
    z1b = jax.random.uniform(k3, (B2, D), minval=-1.0, maxval=1.0, dtype=jnp.float32)
    z2b = jax.random.uniform(k4, (B2, D), minval=-1.0, maxval=1.0, dtype=jnp.float32)
    out2 = on_right_valuation(z1b, z2b, use_kernel=True)
    jax.block_until_ready(out2)
    ref2 = _reference(z1b, z2b)
    assert out2.shape == (B2,)
    assert jnp.allclose(out2, ref2, atol=1e-4), float(jnp.max(jnp.abs(out2 - ref2)))

    # Multi-block grid check (small rt so several grid steps run).
    B3 = 3000
    k5, k6 = jax.random.split(k4)
    z1c = jax.random.uniform(k5, (B3, D), minval=-2.0, maxval=2.0, dtype=jnp.float32)
    z2c = jax.random.uniform(k6, (B3, D), minval=-2.0, maxval=2.0, dtype=jnp.float32)
    out3 = on_right_valuation(z1c, z2c, target_rows=8, use_kernel=True)
    jax.block_until_ready(out3)
    ref3 = _reference(z1c, z2c)
    assert out3.shape == (B3,)
    assert jnp.allclose(out3, ref3, atol=1e-4), float(jnp.max(jnp.abs(out3 - ref3)))

    print("KERNEL_OK")
</pallas_src>

<mosaic_0001>
module attributes {stable_mosaic.version = 11 : i64} {
  func.func @_on_right_kernel(%arg0: i32, %arg1: memref<8x128xf32, #tpu.memory_space<vmem>>, %arg2: memref<8x128xf32, #tpu.memory_space<vmem>>, %arg3: memref<8x128xf32, #tpu.memory_space<vmem>>, %arg4: memref<8x128xf32, #tpu.memory_space<vmem>>, %arg5: memref<8x128xf32, #tpu.memory_space<vmem>>) attributes {dimension_semantics = [#tpu.dimension_semantics<parallel>], iteration_bounds = array<i64: 1>, scalar_prefetch = 0 : i64, scratch_operands = 0 : i64, tpu.core_type = #tpu.core_type<tc>, window_params = [{transform_indices = @transform_0, window_bounds = array<i64: 8, 128>}, {transform_indices = @transform_1, window_bounds = array<i64: 8, 128>}, {transform_indices = @transform_2, window_bounds = array<i64: 8, 128>}, {transform_indices = @transform_3, window_bounds = array<i64: 8, 128>}, {transform_indices = @transform_4, window_bounds = array<i64: 8, 128>}]} {
    %c0 = arith.constant 0 : index
    %c0_0 = arith.constant 0 : index
    %0 = vector.load %arg1[%c0, %c0_0] : memref<8x128xf32, #tpu.memory_space<vmem>>, vector<8x128xf32>
    %c0_1 = arith.constant 0 : index
    %c0_2 = arith.constant 0 : index
    %1 = vector.load %arg3[%c0_1, %c0_2] : memref<8x128xf32, #tpu.memory_space<vmem>>, vector<8x128xf32>
    %2 = arith.subf %0, %1 : vector<8x128xf32>
    %c0_3 = arith.constant 0 : index
    %c0_4 = arith.constant 0 : index
    %3 = vector.load %arg2[%c0_3, %c0_4] : memref<8x128xf32, #tpu.memory_space<vmem>>, vector<8x128xf32>
    %c0_5 = arith.constant 0 : index
    %c0_6 = arith.constant 0 : index
    %4 = vector.load %arg4[%c0_5, %c0_6] : memref<8x128xf32, #tpu.memory_space<vmem>>, vector<8x128xf32>
    %5 = arith.subf %3, %4 : vector<8x128xf32>
    %6 = math.absf %2 : vector<8x128xf32>
    %7 = math.absf %5 : vector<8x128xf32>
    %cst = arith.constant 2.41421366 : f32
    %8 = vector.broadcast %cst : f32 to vector<8x128xf32>
    %9 = arith.mulf %6, %8 : vector<8x128xf32>
    %10 = arith.cmpf ogt, %7, %9 : vector<8x128xf32>
    %cst_7 = arith.constant 0.414213568 : f32
    %11 = vector.broadcast %cst_7 : f32 to vector<8x128xf32>
    %12 = arith.mulf %6, %11 : vector<8x128xf32>
    %13 = arith.cmpf ogt, %7, %12 : vector<8x128xf32>
    %cst_8 = arith.constant 0.000000e+00 : f32
    %14 = vector.broadcast %cst_8 : f32 to vector<8x128xf32>
    %15 = arith.subf %14, %6 : vector<8x128xf32>
    %16 = arith.subf %7, %6 : vector<8x128xf32>
    %17 = arith.select %13, %16, %7 : vector<8x128xi1>, vector<8x128xf32>
    %18 = arith.select %10, %15, %17 : vector<8x128xi1>, vector<8x128xf32>
    %19 = arith.addf %6, %7 : vector<8x128xf32>
    %cst_9 = arith.constant 0.000000e+00 : f32
    %20 = vector.broadcast %cst_9 : f32 to vector<8x128xf32>
    %21 = arith.cmpf ogt, %6, %20 : vector<8x128xf32>
    %cst_10 = arith.constant 1.000000e+00 : f32
    %22 = vector.broadcast %cst_10 : f32 to vector<8x128xf32>
    %23 = arith.select %21, %6, %22 : vector<8x128xi1>, vector<8x128xf32>
    %24 = arith.select %13, %19, %23 : vector<8x128xi1>, vector<8x128xf32>
    %25 = arith.select %10, %7, %24 : vector<8x128xi1>, vector<8x128xf32>
    %26 = arith.divf %18, %25 : vector<8x128xf32>
    %cst_11 = arith.constant 0.785398185 : f32
    %cst_12 = arith.constant 0.000000e+00 : f32
    %27 = vector.broadcast %cst_11 : f32 to vector<8x128xf32>
    %28 = vector.broadcast %cst_12 : f32 to vector<8x128xf32>
    %29 = arith.select %13, %27, %28 : vector<8x128xi1>, vector<8x128xf32>
    %cst_13 = arith.constant 1.57079637 : f32
    %30 = vector.broadcast %cst_13 : f32 to vector<8x128xf32>
    %31 = arith.select %10, %30, %29 : vector<8x128xi1>, vector<8x128xf32>
    %32 = arith.mulf %26, %26 : vector<8x128xf32>
    %cst_14 = arith.constant 0.0805374458 : f32
    %33 = vector.broadcast %cst_14 : f32 to vector<8x128xf32>
    %34 = arith.mulf %33, %32 : vector<8x128xf32>
    %cst_15 = arith.constant 0.138776854 : f32
    %35 = vector.broadcast %cst_15 : f32 to vector<8x128xf32>
    %36 = arith.subf %34, %35 : vector<8x128xf32>
    %37 = arith.mulf %36, %32 : vector<8x128xf32>
    %cst_16 = arith.constant 0.199777111 : f32
    %38 = vector.broadcast %cst_16 : f32 to vector<8x128xf32>
    %39 = arith.addf %37, %38 : vector<8x128xf32>
    %40 = arith.mulf %39, %32 : vector<8x128xf32>
    %cst_17 = arith.constant 0.333329499 : f32
    %41 = vector.broadcast %cst_17 : f32 to vector<8x128xf32>
    %42 = arith.subf %40, %41 : vector<8x128xf32>
    %43 = arith.mulf %42, %32 : vector<8x128xf32>
    %44 = arith.mulf %43, %26 : vector<8x128xf32>
    %45 = arith.addf %44, %26 : vector<8x128xf32>
    %46 = arith.addf %31, %45 : vector<8x128xf32>
    %cst_18 = arith.constant 0.000000e+00 : f32
    %47 = vector.broadcast %cst_18 : f32 to vector<8x128xf32>
    %48 = arith.cmpf oge, %2, %47 : vector<8x128xf32>
    %cst_19 = arith.constant 0.572957814 : f32
    %49 = vector.broadcast %cst_19 : f32 to vector<8x128xf32>
    %50 = arith.mulf %49, %46 : vector<8x128xf32>
    %cst_20 = arith.constant 0.899999976 : f32
    %51 = vector.broadcast %cst_20 : f32 to vector<8x128xf32>
    %52 = arith.subf %51, %50 : vector<8x128xf32>
    %cst_21 = arith.constant 0.000000e+00 : f32
    %53 = vector.broadcast %cst_21 : f32 to vector<8x128xf32>
    %54 = arith.select %48, %52, %53 : vector<8x128xi1>, vector<8x128xf32>
    %c0_22 = arith.constant 0 : index
    %c0_23 = arith.constant 0 : index
    %55 = vector.load %arg5[%c0_22, %c0_23] : memref<8x128xf32, #tpu.memory_space<vmem>>, vector<8x128xf32>
    tpu.vector_store %arg5[%c0_22, %c0_23], %54 {strides = array<i32>} : memref<8x128xf32, #tpu.memory_space<vmem>>, vector<8x128xf32>,
    return
  }
  func.func @transform_0(%arg0: i32) -> (i32, i32) {
    %c0_i32 = arith.constant 0 : i32
    %c0_i32_0 = arith.constant 0 : i32
    return %arg0, %c0_i32 : i32, i32
  }
  func.func @transform_1(%arg0: i32) -> (i32, i32) {
    %c0_i32 = arith.constant 0 : i32
    %c0_i32_0 = arith.constant 0 : i32
    return %arg0, %c0_i32 : i32, i32
  }
  func.func @transform_2(%arg0: i32) -> (i32, i32) {
    %c0_i32 = arith.constant 0 : i32
    %c0_i32_0 = arith.constant 0 : i32
    return %arg0, %c0_i32 : i32, i32
  }
  func.func @transform_3(%arg0: i32) -> (i32, i32) {
    %c0_i32 = arith.constant 0 : i32
    %c0_i32_0 = arith.constant 0 : i32
    return %arg0, %c0_i32 : i32, i32
  }
  func.func @transform_4(%arg0: i32) -> (i32, i32) {
    %c0_i32 = arith.constant 0 : i32
    %c0_i32_0 = arith.constant 0 : i32
    return %arg0, %c0_i32 : i32, i32
  }
}

</mosaic_0001>

<bundles_post_ra>
// kernel: tpu_custom_call.1
= control target key start
LH: loop header
LB: loop body
LE: loop exit
PB: predicated region body
PF: predicated region fallthrough
CT: control target
= control target key end

     0   :  { %9 = vsyncpa [#allocation3], 0  ;;  %s293_s0 = inlined_call_operand.hbm [shape: f32[8,128], index: 0, kind: input, shape index: {}]   ;;  %s294_s1 = inlined_call_operand.hbm [shape: f32[8,128], index: 1, kind: input, shape index: {}]   ;;  %s295_s2 = inlined_call_operand.hbm [shape: f32[8,128], index: 2, kind: input, shape index: {}]   ;;  %s296_s3 = inlined_call_operand.hbm [shape: f32[8,128], index: 3, kind: input, shape index: {}]   ;;  %s297_s4 = inlined_call_operand.hbm [shape: f32[8,128], index: 4, kind: output, shape index: {}]  }
   0x1   :  { %10 = vsyncpa [#allocation6], 0 }
   0x2   :  { %11 = vsyncpa [#allocation9], 0 }
   0x3   :  { %12 = vsyncpa [#allocation4], 0  ;;  %s241_s15 = smov [#allocation5]   ;;  %s242_s17 = smov [#allocation2]  }
   0x4   :  { %s29_s16 = sshll.u32 %s241_s15, 4  ;;  %s19_s18 = sshll.u32 %s242_s17, 4  ;;  %s30_s16 = int_to_ptr.vmem [resolvable:$true] %s29_s16  ;;  %s20_s18 = int_to_ptr.vmem [resolvable:$true] %s19_s18 }
   0x5   :  { %s141_s19 = scalar_lea.vmem %s30_s16, 128  ;;  %p146_p1 = scmp.lt.s32.totalorder %s30_s16, %s30_s16 }
   0x6   :  { %p142_p0 = scmp.ne.s32.totalorder %s30_s16, %s141_s19  ;;  %p147_p2 = scmp.lt.s32.totalorder %s141_s19, %s141_s19 }
   0x8   :  { %p148_p3 = por %p147_p2, %p146_p1 }
   0xa   :  { %p149_p4 = pnand %p148_p3, %p142_p0 }
   0xc   :  { %152 = shalt.err (!%p149_p4)
}
   0xd   :  { %32 = dma.hbm_to_vmem [thread:$0]  %s294_s1, 128, %s30_s16, [#allocation6]  }
   0xe   :  { %s161_s22 = scalar_lea.vmem %s20_s18, 128  ;;  %p166_p6 = scmp.lt.s32.totalorder %s20_s18, %s20_s18 }
   0xf   :  { %p162_p5 = scmp.ne.s32.totalorder %s20_s18, %s161_s22  ;;  %p167_p7 = scmp.lt.s32.totalorder %s161_s22, %s161_s22 }
  0x11   :  { %p168_p8 = por %p167_p7, %p166_p6 }
  0x13   :  { %p169_p9 = pnand %p168_p8, %p162_p5 }
  0x15   :  { %172 = shalt.err (!%p169_p9)
}
  0x16   :  { %22 = dma.hbm_to_vmem [thread:$0]  %s293_s0, 128, %s20_s18, [#allocation3]  }
  0x17   :  { %s243_s25 = smov [#allocation7]   ;;  %s244_s27 = smov [#allocation8]  }
  0x18   :  { %s39_s26 = sshll.u32 %s243_s25, 4  ;;  %s49_s28 = sshll.u32 %s244_s27, 4  ;;  %s40_s26 = int_to_ptr.vmem [resolvable:$true] %s39_s26  ;;  %s50_s28 = int_to_ptr.vmem [resolvable:$true] %s49_s28 }
  0x19   :  { %s181_s29 = scalar_lea.vmem %s40_s26, 128  ;;  %p186_p11 = scmp.lt.s32.totalorder %s40_s26, %s40_s26 }
  0x1a   :  { %p182_p10 = scmp.ne.s32.totalorder %s40_s26, %s181_s29  ;;  %p187_p12 = scmp.lt.s32.totalorder %s181_s29, %s181_s29 }
  0x1c   :  { %p188_p13 = por %p187_p12, %p186_p11 }
  0x1e   :  { %p189_p0 = pnand %p188_p13, %p182_p10 }
  0x20   :  { %192 = shalt.err (!%p189_p0)
}
  0x21   :  { %42 = dma.hbm_to_vmem [thread:$0]  %s295_s2, 128, %s40_s26, [#allocation6]  }
  0x22   :  { %s201_s5 = scalar_lea.vmem %s50_s28, 128  ;;  %p206_p2 = scmp.lt.s32.totalorder %s50_s28, %s50_s28 }
  0x23   :  { %p202_p1 = scmp.ne.s32.totalorder %s50_s28, %s201_s5  ;;  %p207_p3 = scmp.lt.s32.totalorder %s201_s5, %s201_s5 }
  0x25   :  { %p208_p4 = por %p207_p3, %p206_p2 }
  0x27   :  { %p209_p5 = pnand %p208_p4, %p202_p1 }
  0x29   :  { %212 = shalt.err (!%p209_p5)
}
  0x2a   :  { %52 = dma.hbm_to_vmem [thread:$0]  %s296_s3, 128, %s50_s28, [#allocation9]  }
  0x2b   :  { %233 = dma.done.wait [#allocation3], 128  }
  0x2c   :  { %234 = vsyncadd [#allocation3], 4294967168 }
  0x2d   :  { %235 = dma.done.wait [#allocation6], 256  }
  0x2e   :  { %236 = vsyncadd [#allocation6], 4294967040 }
  0x2f   :  { %237 = dma.done.wait [#allocation9], 128  }
  0x30   :  { %238 = vsyncadd [#allocation9], 4294967168  ;;  %v65_v0 = vld [vmem:[#allocation2] sm:$0xff]  ;;  %v66_v1 = vld [vmem:[#allocation7] sm:$0xff]  ;;  %v245_v27 = vmov 0.0   ;;  %s246_s2 = smov [#allocation10]  }
  0x31   :  { %v68_v2 = vld [vmem:[#allocation5] sm:$0xff]  ;;  %v67_v3 = vsub.f32 %v65_v0, %v66_v1  ;;  %v69_v4 = vld [vmem:[#allocation8] sm:$0xff]  ;;  %s112_s3 = sshll.u32 %s246_s2, 4  ;;  %s113_s3 = int_to_ptr.vmem [resolvable:$true] %s112_s3 }
  0x32   :  { %v70_v5 = vsub.f32 %v68_v2, %v69_v4  ;;  %s213_s7 = scalar_lea.vmem %s113_s3, 128  ;;  %p218_p7 = scmp.lt.s32.totalorder %s113_s3, %s113_s3 }
  0x33   :  { %v71_v6 = vand.u32 2147483647, %v67_v3  ;;  %vm101_vm3 = vcmp.ge.f32.partialorder %v67_v3, 0.0  ;;  %p214_p6 = scmp.ne.s32.totalorder %s113_s3, %s213_s7  ;;  %p219_p8 = scmp.lt.s32.totalorder %s213_s7, %s213_s7 }
  0x34   :  { %v72_v7 = vand.u32 2147483647, %v70_v5 }
  0x35   :  { %v73_v8 = vmul.f32 2.4142137, %v71_v6  ;;  %v75_v9 = vmul.f32 0.41421357, %v71_v6  ;;  %vm82_vm0 = vcmp.gt.f32.partialorder %v71_v6, 0.0  ;;  %v77_v15 = vsub.f32 0.0, %v71_v6  ;;  %p220_p9 = por %p219_p8, %p218_p7 }
  0x36   :  { %v81_v10 = vadd.f32 %v72_v7, %v71_v6  ;;  %v83_v11 = vsel %vm82_vm0, %v71_v6, 1.0  ;;  %v78_v14 = vsub.f32 %v72_v7, %v71_v6 }
  0x37   :  { %vm74_vm1 = vcmp.gt.f32.partialorder %v72_v7, %v73_v8  ;;  %vm76_vm2 = vcmp.gt.f32.partialorder %v72_v7, %v75_v9  ;;  %p221_p10 = pnand %p220_p9, %p214_p6 }
  0x38   :  { %v84_v12 = vsel %vm76_vm2, %v81_v10, %v83_v11  ;;  %v79_v16 = vsel %vm76_vm2, %v78_v14, %v72_v7  ;;  %v88_v28 = vsel %vm76_vm2, 0.7853982, %v245_v27 }
  0x39   :  { %v85_v13 = vsel %vm74_vm1, %v72_v7, %v84_v12  ;;  %v80_v17 = vsel %vm74_vm1, %v77_v15, %v79_v16  ;;  %v89_v31 = vsel %vm74_vm1, 1.5707964, %v88_v28 }
  0x3a   :  { %131 = vrcp.f32 %v85_v13 }
  0x47   :  { %v132_v18 = vpop.eup %131 }
  0x48   :  { %v87_v19 = vmul.f32 %v132_v18, %v80_v17 }
  0x4a   :  { %v90_v20 = vmul.f32 %v87_v19, %v87_v19 }
  0x4c   :  { %v91_v21 = vmul.f32 0.080537446, %v90_v20 }
  0x4e   :  { %v123_v22 = vadd.f32 -0.13877685, %v91_v21 }
  0x50   :  { %v93_v23 = vmul.f32 %v123_v22, %v90_v20 }
  0x52   :  { %v94_v24 = vadd.f32 0.19977711, %v93_v23 }
  0x54   :  { %v95_v25 = vmul.f32 %v94_v24, %v90_v20 }
  0x56   :  { %v124_v26 = vadd.f32 -0.3333295, %v95_v25 }
  0x58   :  { %v97_v29 = vmul.f32 %v124_v26, %v90_v20 }
  0x5a   :  { %v98_v30 = vmul.f32 %v97_v29, %v87_v19 }
  0x5c   :  { %v99_v32 = vadd.f32 %v98_v30, %v87_v19 }
  0x5e   :  { %v100_v33 = vadd.f32 %v99_v32, %v89_v31 }
  0x60   :  { %v102_v34 = vmul.f32 0.5729578, %v100_v33 }
  0x62   :  { %v103_v35 = vsub.f32 0.9, %v102_v34 }
  0x64   :  { %v104_v36 = vsel %vm101_vm3, %v103_v35, 0.0 }
  0x65   :  { %105 = vst [vmem:[#allocation10] sm:$0xff] %v104_v36 }
  0x66   :  { %224 = shalt.err (!%p221_p10)
}
  0x67   :  { %115 = dma.vmem_to_hbm [thread:$0]  %s113_s3, 128, %s297_s4, [#allocation4]  }
  0x68   :  { %239 = dma.done.wait [#allocation4], 128  }
  0x69   :  { %240 = vsyncadd [#allocation4], 4294967168 }
  0x6a   :  { %119 = vsyncpa [#allocation3], 1 }
  0x6b   :  { %120 = vsyncpa [#allocation6], 1 }
  0x6c   :  { %121 = vsyncpa [#allocation9], 1 }
  0x6d   :  { %122 = vsyncpa [#allocation4], 1 }

</bundles_post_ra>
